<compile_context>
chip_gen: v7x
topology: tpu7x:2x2x1
jax: 0.10.0
libtpu: 0.0.40
codegen_flags: <defaults>
</compile_context>

<pallas_src>
import functools
import math

import jax
import jax.numpy as jnp
from jax.experimental import pallas as pl
from jax.experimental.pallas import tpu as pltpu


def _cdiv(a, b):
    return -(-a // b)


def _device_params():
    """Per-generation tuning (review): bigger blocks + more scoped VMEM on v7x only."""
    block_bytes, vmem_limit = 2 * 1024 * 1024, 32 * 1024 * 1024
    try:
        kind = jax.devices()[0].device_kind.lower()
    except Exception:  # defensive: never fail planning because of a device query
        kind = ""
    if "v7" in kind:
        block_bytes, vmem_limit = 4 * 1024 * 1024, 48 * 1024 * 1024
    return block_bytes, vmem_limit


def _plan_tiling(total, period, block_bytes, itemsize, cap_lanes=4096):
    """Pick (lanes, rows, tm) with lanes % period == 0, lanes * rows == total and tm | rows.

    That makes the wrapper reshape a free bitcast (no HBM pad copy) and keeps every grid
    block fully in bounds (no boundary masking in the kernel).  Returns None when `total`
    has no usable factorization; the caller then uses the sentinel-pad fallback.
    """
    base = (period * 128) // math.gcd(period, 128)            # lcm(period, 128)
    aligned = []
    if total % base == 0:
        aligned = [k * base for k in range(max(1, cap_lanes // base), 0, -1)
                   if total % (k * base) == 0]
    aligned_set = set(aligned)
    q = total // period
    hi = max(1, min(q, cap_lanes // period))
    unaligned = [period * d for d in range(hi, 0, -1)
                 if q % d == 0 and (period * d) not in aligned_set]

    for lanes in aligned + unaligned:                          # prefer 128-aligned, then wide
        if lanes < 128:        # lane-sparse layouts waste the vreg; pad fallback is better
            continue
        rows = total // lanes
        if rows < 8 or rows % 8 != 0:                          # tm must be a multiple of 8
            continue
        tm_cap = min(2048, rows, max(8, (block_bytes // (lanes * itemsize)) // 8 * 8))
        tm = 0
        for k in range(tm_cap // 8, 0, -1):                    # largest multiple of 8 dividing rows
            if rows % (8 * k) == 0:
                tm = 8 * k
                break
        if tm == 0 or tm * lanes * itemsize > 2 * block_bytes:
            continue
        return lanes, rows, tm
    return None


def _fallback_tiling(total, period, block_bytes, itemsize):
    """Sentinel-pad fallback: ~1K lanes, rows padded up to a multiple of tm."""
    base = (period * 128) // math.gcd(period, 128)
    lanes = base * max(1, min(8, 1024 // base))
    tm = max(8, min(1024, (block_bytes // (lanes * itemsize)) // 8 * 8))
    rows_needed = _cdiv(total, lanes)
    tm = max(8, min(tm, _cdiv(rows_needed, 8) * 8))            # don't over-pad tiny tensors
    rows = _cdiv(rows_needed, tm) * tm
    return lanes, rows, tm


def _focal_kernel(x_ref, t_ref, out_ref, *, gamma, lanes, strip, n_inner, binary_targets):
    """Accumulate per-lane sums of (1 - pt)**gamma * BCE into a resident (8, lanes) block."""
    s = pl.program_id(1)

    @pl.when(s == 0)
    def _init():
        out_ref[...] = jnp.zeros_like(out_ref)

    g = float(gamma)
    small_int_gamma = g.is_integer() and 0.0 <= g <= 8.0

    def _accum_strip(r0):
        x = x_ref[pl.ds(r0, strip), :].astype(jnp.float32)
        t = t_ref[pl.ds(r0, strip), :].astype(jnp.float32)
        # Numerically stable binary_cross_entropy_with_logits (reduction='none'):
        #   bce = max(x, 0) - x*t + log1p(exp(-|x|))
        ex = jnp.exp(-jnp.abs(x))
        bce = jnp.maximum(x, 0.0) - x * t + jnp.log1p(ex)
        if binary_targets:
            # Exact for t in {0, 1}: exp(-bce) = where(sign(x) matches t, 1, ex) / (1 + ex);
            # saves one full exp per element (the kernel is EUP-bound on v7x).
            pt = jnp.where((x > 0.0) == (t > 0.5), 1.0, ex) / (1.0 + ex)
        else:
            pt = jnp.exp(-bce)
        one_minus_pt = 1.0 - pt
        if small_int_gamma:
            gi = int(g)
            w = jnp.ones_like(one_minus_pt) if gi == 0 else one_minus_pt
            for _ in range(max(0, gi - 1)):                    # gamma=2 -> one extra VPU multiply
                w = w * one_minus_pt
        else:
            # TODO(synk): non-integer gamma uses pow (exp/log on the EUP); forward is fine but
            # it would give NaN gradients at pt == 1 if this kernel were ever differentiated.
            w = one_minus_pt ** g
        # alpha is applied once per lane in the wrapper; collapse the strip onto 8 sublanes
        # (leading-dim reshape is free, the reduction is pure VPU adds).
        out_ref[...] += (w * bce).reshape(strip // 8, 8, lanes).sum(axis=0)

    if n_inner == 1:
        _accum_strip(0)
    else:
        # Rolled loop: bounds f32 intermediates to one ~0.5 MiB strip regardless of block size.
        def _body(i, carry):
            _accum_strip(pl.multiple_of(i * strip, 8))
            return carry
        jax.lax.fori_loop(0, n_inner, _body, 0)


def focal_loss_3d(inputs, targets, alpha, gamma=2.0, *, assume_binary_targets=False):
    """JAX/Pallas equivalent of FocalLoss_3d(gamma, alpha)(inputs, targets)."""
    assert inputs.shape == targets.shape
    assert inputs.ndim >= 2
    num_classes = targets.shape[1]
    alpha = jnp.asarray(alpha, jnp.float32).reshape(-1)
    assert alpha.shape[0] == num_classes, (
        f"Length of weight tensor must match the number of classes. "
        f"got {num_classes} expected {alpha.shape[0]}")

    W = inputs.shape[-1]
    # The PyTorch module broadcasts alpha (len C) against the LAST axis, so it only runs
    # when the last dim equals num_classes; keep the same constraint.
    assert W == num_classes, "PyTorch broadcast of alpha (len C) over the last axis needs last dim == C"

    total = math.prod(inputs.shape)
    block_bytes, vmem_limit = _device_params()
    itemsize = max(inputs.dtype.itemsize, targets.dtype.itemsize)

    plan = _plan_tiling(total, W, block_bytes, itemsize)
    if plan is not None:
        lanes, rows, tm = plan
        x2 = inputs.reshape(rows, lanes)                       # free bitcast: lanes * rows == total
        t2 = targets.reshape(rows, lanes)
    else:
        # Pathological factorization: pad with sentinels whose focal term is exactly 0
        # (x = most-negative finite, t = 0 -> bce = 0 and 1 - pt = 0), so no in-kernel mask.
        lanes, rows, tm = _fallback_tiling(total, W, block_bytes, itemsize)
        pad = rows * lanes - total
        if jnp.issubdtype(inputs.dtype, jnp.floating):
            x_pad = float(jnp.finfo(inputs.dtype).min)         # NOT -inf: -inf * 0 = NaN
        else:
            x_pad = int(jnp.iinfo(inputs.dtype).min)
        x2 = jnp.pad(inputs.reshape(-1), (0, pad), constant_values=x_pad).reshape(rows, lanes)
        t2 = jnp.pad(targets.reshape(-1), (0, pad), constant_values=0).reshape(rows, lanes)

    nblocks = rows // tm
    n_par = 2 if (nblocks >= 2 and nblocks % 2 == 0) else 1    # megacore split when it divides
    steps = nblocks // n_par

    # Strip-mine each block so f32 intermediates stay ~0.5 MiB irrespective of block size.
    strip = min(tm, max(8, ((512 * 1024) // (lanes * 4)) // 8 * 8))
    while tm % strip:
        strip -= 8
    n_inner = tm // strip

    kernel = functools.partial(
        _focal_kernel, gamma=float(gamma), lanes=lanes, strip=strip, n_inner=n_inner,
        binary_targets=bool(assume_binary_targets))

    n_transcendental = 2 if assume_binary_targets else 3
    cost = pl.CostEstimate(
        flops=int(12 * total),
        transcendentals=int(n_transcendental * total),
        bytes_accessed=int(x2.size * x2.dtype.itemsize + t2.size * t2.dtype.itemsize
                           + n_par * 8 * lanes * 4))

    out = pl.pallas_call(
        kernel,
        out_shape=jax.ShapeDtypeStruct((n_par * 8, lanes), jnp.float32),
        grid_spec=pltpu.PrefetchScalarGridSpec(
            num_scalar_prefetch=0,
            grid=(n_par, steps),
            in_specs=[
                pl.BlockSpec((tm, lanes), lambda p, s: (p * steps + s, 0)),   # logits tile
                pl.BlockSpec((tm, lanes), lambda p, s: (p * steps + s, 0)),   # targets tile
            ],
            out_specs=pl.BlockSpec((8, lanes), lambda p, s: (p, 0)),          # per-slice partial sums
        ),
        compiler_params=pltpu.CompilerParams(
            dimension_semantics=("parallel", "arbitrary"),
            vmem_limit_bytes=vmem_limit),
        cost_estimate=cost,
    )(x2, t2)

    # Deferred alpha: lane j of the (rows, lanes) view is class (j % W) because lanes % W == 0,
    # so one per-lane weight reproduces PyTorch's broadcast.  Mean over the TRUE element count.
    alpha_row = jnp.tile(alpha, lanes // W)
    return jnp.sum(out * alpha_row) / jnp.float32(total)


if __name__ == "__main__":
    def reference(x, t, a, g):
        x = x.astype(jnp.float32)
        t = t.astype(jnp.float32)
        bce = jnp.maximum(x, 0.0) - x * t + jnp.log1p(jnp.exp(-jnp.abs(x)))
        pt = jnp.exp(-bce)
        return jnp.mean(a * (1.0 - pt) ** g * bce)

    key = jax.random.PRNGKey(0)
    gamma = 2.0

    # (shape, assume_binary_targets); last dim == C so the PyTorch alpha broadcast is defined.
    cases = [
        ((2, 4, 8, 8, 4), False),      # small, 128-aligned lane plan, single block
        ((3, 4, 8, 10, 4), False),     # plan falls to a non-128-multiple lane width (still no pad)
        ((2, 4, 256, 256, 4), False),  # multi-block: n_par=2, cross-step accumulation, strip loop
        ((2, 4, 8, 8, 4), True),       # binary-target fast path (2 transcendentals/elem)
        ((1, 4, 2, 65537, 4), False),  # pathological factorization -> sentinel-pad fallback
    ]
    for shape, binary in cases:
        key, k1, k2 = jax.random.split(key, 3)
        C = shape[1]
        inputs = jax.random.normal(k1, shape, dtype=jnp.float32)
        targets = (jax.random.uniform(k2, shape) > 0.5).astype(jnp.float32)
        alpha = jnp.linspace(0.25, 1.0, C).astype(jnp.float32)

        loss = jax.block_until_ready(
            focal_loss_3d(inputs, targets, alpha, gamma=gamma, assume_binary_targets=binary))
        ref = reference(inputs, targets, alpha, gamma)
        assert jnp.allclose(loss, ref, rtol=1e-4, atol=1e-6), (shape, binary, float(loss), float(ref))

    print("KERNEL_OK")
</pallas_src>

<mosaic_0001>
module attributes {stable_mosaic.version = 11 : i64} {
  func.func @_focal_kernel(%arg0: i32, %arg1: i32, %arg2: memref<8x256xf32, #tpu.memory_space<vmem>>, %arg3: memref<8x256xf32, #tpu.memory_space<vmem>>, %arg4: memref<8x256xf32, #tpu.memory_space<vmem>>) attributes {dimension_semantics = [#tpu.dimension_semantics<parallel>, #tpu.dimension_semantics<arbitrary>], iteration_bounds = array<i64: 1, 1>, scalar_prefetch = 0 : i64, scratch_operands = 0 : i64, tpu.core_type = #tpu.core_type<tc>, window_params = [{transform_indices = @transform_0, window_bounds = array<i64: 8, 256>}, {transform_indices = @transform_1, window_bounds = array<i64: 8, 256>}, {transform_indices = @transform_2, window_bounds = array<i64: 8, 256>}]} {
    %c0_i32 = arith.constant 0 : i32
    %0 = arith.cmpi eq, %arg1, %c0_i32 : i32
    %1 = arith.extui %0 : i1 to i32
    %c0_i32_0 = arith.constant 0 : i32
    %2 = arith.cmpi ne, %1, %c0_i32_0 : i32
    scf.if %2 {
      %cst_12 = arith.constant 0.000000e+00 : f32
      %27 = vector.broadcast %cst_12 : f32 to vector<8x256xf32>
      %c0_13 = arith.constant 0 : index
      %c0_14 = arith.constant 0 : index
      %28 = vector.load %arg4[%c0_13, %c0_14] : memref<8x256xf32, #tpu.memory_space<vmem>>, vector<8x256xf32>
      tpu.vector_store %arg4[%c0_13, %c0_14], %27 {strides = array<i32>} : memref<8x256xf32, #tpu.memory_space<vmem>>, vector<8x256xf32>,
    } else {
    }
    %c0 = arith.constant 0 : index
    %c0_1 = arith.constant 0 : index
    %3 = vector.load %arg2[%c0, %c0_1] : memref<8x256xf32, #tpu.memory_space<vmem>>, vector<8x256xf32>
    %c0_2 = arith.constant 0 : index
    %c0_3 = arith.constant 0 : index
    %4 = vector.load %arg3[%c0_2, %c0_3] : memref<8x256xf32, #tpu.memory_space<vmem>>, vector<8x256xf32>
    %5 = math.absf %3 : vector<8x256xf32>
    %cst = arith.constant 0.000000e+00 : f32
    %6 = vector.broadcast %cst : f32 to vector<8x256xf32>
    %7 = arith.subf %6, %5 : vector<8x256xf32>
    %8 = math.exp %7 : vector<8x256xf32>
    %cst_4 = arith.constant 0.000000e+00 : f32
    %9 = vector.broadcast %cst_4 : f32 to vector<8x256xf32>
    %10 = arith.maximumf %3, %9 : vector<8x256xf32>
    %11 = arith.mulf %3, %4 : vector<8x256xf32>
    %12 = arith.subf %10, %11 : vector<8x256xf32>
    %13 = math.log1p %8 : vector<8x256xf32>
    %14 = arith.addf %12, %13 : vector<8x256xf32>
    %cst_5 = arith.constant 0.000000e+00 : f32
    %15 = vector.broadcast %cst_5 : f32 to vector<8x256xf32>
    %16 = arith.subf %15, %14 : vector<8x256xf32>
    %17 = math.exp %16 : vector<8x256xf32>
    %cst_6 = arith.constant 1.000000e+00 : f32
    %18 = vector.broadcast %cst_6 : f32 to vector<8x256xf32>
    %19 = arith.subf %18, %17 : vector<8x256xf32>
    %20 = arith.mulf %19, %19 : vector<8x256xf32>
    %c0_7 = arith.constant 0 : index
    %c0_8 = arith.constant 0 : index
    %21 = vector.load %arg4[%c0_7, %c0_8] : memref<8x256xf32, #tpu.memory_space<vmem>>, vector<8x256xf32>
    %22 = arith.mulf %20, %14 : vector<8x256xf32>
    %23 = vector.shape_cast %22 : vector<8x256xf32> to vector<1x8x256xf32>
    %cst_9 = arith.constant dense<0.000000e+00> : vector<8x256xf32>
    %24 = vector.multi_reduction <add>, %23, %cst_9 [0] : vector<1x8x256xf32> to vector<8x256xf32>
    %25 = arith.addf %21, %24 : vector<8x256xf32>
    %c0_10 = arith.constant 0 : index
    %c0_11 = arith.constant 0 : index
    %26 = vector.load %arg4[%c0_10, %c0_11] : memref<8x256xf32, #tpu.memory_space<vmem>>, vector<8x256xf32>
    tpu.vector_store %arg4[%c0_10, %c0_11], %25 {strides = array<i32>} : memref<8x256xf32, #tpu.memory_space<vmem>>, vector<8x256xf32>,
    return
  }
  func.func @transform_0(%arg0: i32, %arg1: i32) -> (i32, i32) {
    %c1_i32 = arith.constant 1 : i32
    %0 = arith.muli %arg0, %c1_i32 : i32
    %1 = arith.addi %0, %arg1 : i32
    %c0_i32 = arith.constant 0 : i32
    %c0_i32_0 = arith.constant 0 : i32
    return %1, %c0_i32 : i32, i32
  }
  func.func @transform_1(%arg0: i32, %arg1: i32) -> (i32, i32) {
    %c1_i32 = arith.constant 1 : i32
    %0 = arith.muli %arg0, %c1_i32 : i32
    %1 = arith.addi %0, %arg1 : i32
    %c0_i32 = arith.constant 0 : i32
    %c0_i32_0 = arith.constant 0 : i32
    return %1, %c0_i32 : i32, i32
  }
  func.func @transform_2(%arg0: i32, %arg1: i32) -> (i32, i32) {
    %c0_i32 = arith.constant 0 : i32
    %c0_i32_0 = arith.constant 0 : i32
    return %arg0, %c0_i32 : i32, i32
  }
}

</mosaic_0001>

<bundles_post_ra>
// kernel: tpu_custom_call.1
= control target key start
LH: loop header
LB: loop body
LE: loop exit
PB: predicated region body
PF: predicated region fallthrough
CT: control target
= control target key end

     0   :  { %7 = vsyncpa [#allocation3], 0  ;;  %s268_s0 = inlined_call_operand.hbm [shape: f32[8,256], index: 0, kind: input, shape index: {}]   ;;  %s269_s1 = inlined_call_operand.hbm [shape: f32[8,256], index: 1, kind: input, shape index: {}]   ;;  %s270_s2 = inlined_call_operand.hbm [shape: f32[8,256], index: 2, kind: output, shape index: {}]  }
   0x1   :  { %8 = vsyncpa [#allocation6], 0 }
   0x2   :  { %9 = vsyncpa [#allocation4], 0  ;;  %s214_s9 = smov [#allocation2]   ;;  %s215_s11 = smov [#allocation5]  }
   0x3   :  { %s20_s10 = sshll.u32 %s214_s9, 4  ;;  %s34_s12 = sshll.u32 %s215_s11, 4  ;;  %s21_s10 = int_to_ptr.vmem [resolvable:$true] %s20_s10  ;;  %s35_s12 = int_to_ptr.vmem [resolvable:$true] %s34_s12 }
   0x4   :  { %s142_s15 = scalar_lea.hbm %s268_s0, 256 }
   0x5   :  { %p143_p0 = scmp.ne.s32.totalorder %s268_s0, %s142_s15  ;;  %p146_p1 = scmp.lt.u32.totalorder %s142_s15, %s268_s0 }
   0x7   :  { %p148_p2 = pnand %p146_p1, %p143_p0 }
   0x9   :  { %151 = shalt.err (!%p148_p2)
}
   0xa   :  { %s152_s20 = scalar_lea.vmem %s21_s10, 256  ;;  %p157_p4 = scmp.lt.s32.totalorder %s21_s10, %s21_s10 }
   0xb   :  { %p153_p3 = scmp.ne.s32.totalorder %s21_s10, %s152_s20  ;;  %p158_p5 = scmp.lt.s32.totalorder %s152_s20, %s152_s20 }
   0xd   :  { %p159_p6 = por %p158_p5, %p157_p4 }
   0xf   :  { %p160_p7 = pnand %p159_p6, %p153_p3 }
  0x11   :  { %163 = shalt.err (!%p160_p7)
}
  0x12   :  { %23 = dma.hbm_to_vmem [thread:$0]  %s268_s0, 256, %s21_s10, [#allocation3]  }
  0x13   :  { %s164_s25 = scalar_lea.hbm %s269_s1, 256 }
  0x14   :  { %p165_p8 = scmp.ne.s32.totalorder %s269_s1, %s164_s25  ;;  %p168_p9 = scmp.lt.u32.totalorder %s164_s25, %s269_s1 }
  0x16   :  { %p170_p10 = pnand %p168_p9, %p165_p8 }
  0x18   :  { %173 = shalt.err (!%p170_p10)
}
  0x19   :  { %s174_s30 = scalar_lea.vmem %s35_s12, 256  ;;  %p179_p12 = scmp.lt.s32.totalorder %s35_s12, %s35_s12 }
  0x1a   :  { %p175_p11 = scmp.ne.s32.totalorder %s35_s12, %s174_s30  ;;  %p180_p13 = scmp.lt.s32.totalorder %s174_s30, %s174_s30 }
  0x1c   :  { %p181_p0 = por %p180_p13, %p179_p12 }
  0x1e   :  { %p182_p1 = pnand %p181_p0, %p175_p11 }
  0x20   :  { %185 = shalt.err (!%p182_p1)
}
  0x21   :  { %37 = dma.hbm_to_vmem [thread:$0]  %s269_s1, 256, %s35_s12, [#allocation6]  }
  0x22   :  { %208 = dma.done.wait [#allocation3], 256  }
  0x23   :  { %209 = vsyncadd [#allocation3], 4294967040 }
  0x24   :  { %210 = dma.done.wait [#allocation6], 256  }
  0x25   :  { %211 = vsyncadd [#allocation6], 4294967040  ;;  %v52_v0 = vld [vmem:[#allocation2] sm:$0xff]  ;;  %v53_v1 = vld [vmem:[#allocation2 + $0x8] sm:$0xff]  ;;  %s216_s1 = smov [#allocation7]  }
  0x26   :  { %v56_v2 = vand.u32 2147483647, %v52_v0  ;;  %v57_v3 = vand.u32 2147483647, %v53_v1  ;;  %v54_v14 = vld [vmem:[#allocation5] sm:$0xff]  ;;  %v55_v15 = vld [vmem:[#allocation5 + $0x8] sm:$0xff] }
  0x27   :  { %v64_v17 = vmax.f32 %v52_v0, 0.0  ;;  %v66_v18 = vmul.f32 %v54_v14, %v52_v0  ;;  %v65_v21 = vmax.f32 %v53_v1, 0.0  ;;  %v67_v22 = vmul.f32 %v55_v15, %v53_v1  ;;  %s116_s4 = sshll.u32 %s216_s1, 4  ;;  %s117_s4 = int_to_ptr.vmem [resolvable:$true] %s116_s4 }
  0x28   :  { %v58_v4 = vsub.f32 0.0, %v56_v2  ;;  %v59_v5 = vsub.f32 0.0, %v57_v3  ;;  %s186_s5 = scalar_lea.vmem %s117_s4, 256  ;;  %p191_p3 = scmp.lt.s32.totalorder %s117_s4, %s117_s4 }
  0x29   :  { %v68_v26 = vsub.f32 %v64_v17, %v66_v18  ;;  %v69_v30 = vsub.f32 %v65_v21, %v67_v22  ;;  %p187_p2 = scmp.ne.s32.totalorder %s117_s4, %s186_s5  ;;  %p192_p4 = scmp.lt.s32.totalorder %s186_s5, %s186_s5 }
  0x2a   :  { %v60_v6 = vmul.f32 1.442695, %v58_v4  ;;  %v62_v7 = vmul.f32 1.442695, %v59_v5 }
  0x2b   :  { %p193_p5 = por %p192_p4, %p191_p3 }
  0x2c   :  { %130 = vpow2.f32 %v60_v6 }
  0x2d   :  { %132 = vpow2.f32 %v62_v7  ;;  %p194_p6 = pnand %p193_p5, %p187_p2 }
  0x36   :  { %v131_v8 = vpop.eup %130 }
  0x37   :  { %v133_v9 = vpop.eup %132  ;;  %v70_v10 = vadd.f32 1.0, %v131_v8  ;;  %v73_v12 = vmul.f32 -0.5, %v131_v8  ;;  %v76_v19 = vand.u32 2147483647, %v131_v8 }
  0x38   :  { %v79_v11 = vadd.f32 1.0, %v133_v9  ;;  %v82_v13 = vmul.f32 -0.5, %v133_v9  ;;  %v85_v23 = vand.u32 2147483647, %v133_v9 }
  0x39   :  { %134 = vlog2.f32 %v70_v10  ;;  %v74_v16 = vadd.f32 1.0, %v73_v12  ;;  %vm77_vm0 = vcmp.lt.f32.partialorder %v76_v19, 0.0004427343 }
  0x3a   :  { %136 = vlog2.f32 %v79_v11  ;;  %v83_v20 = vadd.f32 1.0, %v82_v13  ;;  %vm86_vm1 = vcmp.lt.f32.partialorder %v85_v23, 0.0004427343 }
  0x3b   :  { %v75_v24 = vmul.f32 %v131_v8, %v74_v16 }
  0x3c   :  { %v84_v27 = vmul.f32 %v133_v9, %v83_v20 }
  0x43   :  { %v135_v25 = vpop.eup %134 }
  0x44   :  { %v137_v28 = vpop.eup %136  ;;  %v72_v29 = vmul.f32 0.6931472, %v135_v25 }
  0x45   :  { %v81_v31 = vmul.f32 0.6931472, %v137_v28 }
  0x46   :  { %v78_v32 = vsel %vm77_vm0, %v75_v24, %v72_v29 }
  0x47   :  { %v88_v33 = vadd.f32 %v78_v32, %v68_v26  ;;  %v87_v34 = vsel %vm86_vm1, %v84_v27, %v81_v31 }
  0x48   :  { %v89_v35 = vadd.f32 %v87_v34, %v69_v30 }
  0x49   :  { %v90_v36 = vsub.f32 0.0, %v88_v33 }
  0x4a   :  { %v91_v37 = vsub.f32 0.0, %v89_v35 }
  0x4b   :  { %v92_v38 = vmul.f32 1.442695, %v90_v36 }
  0x4c   :  { %v94_v39 = vmul.f32 1.442695, %v91_v37 }
  0x4d   :  { %138 = vpow2.f32 %v92_v38 }
  0x4e   :  { %140 = vpow2.f32 %v94_v39 }
  0x57   :  { %v139_v40 = vpop.eup %138 }
  0x58   :  { %v141_v41 = vpop.eup %140  ;;  %v96_v42 = vsub.f32 1.0, %v139_v40 }
  0x59   :  { %v97_v43 = vsub.f32 1.0, %v141_v41 }
  0x5a   :  { %v98_v44 = vmul.f32 %v96_v42, %v96_v42 }
  0x5b   :  { %v99_v45 = vmul.f32 %v97_v43, %v97_v43 }
  0x5c   :  { %v102_v46 = vmul.f32 %v98_v44, %v88_v33 }
  0x5d   :  { %v103_v47 = vmul.f32 %v99_v45, %v89_v35 }
  0x5e   :  { %108 = vst [vmem:[#allocation7] sm:$0xff] %v102_v46 }
  0x5f   :  { %109 = vst [vmem:[#allocation7 + $0x8] sm:$0xff] %v103_v47 }
  0x60   :  { %197 = shalt.err (!%p194_p6)
}
  0x61   :  { %s198_s8 = scalar_lea.hbm %s270_s2, 256 }
  0x62   :  { %p199_p7 = scmp.ne.s32.totalorder %s270_s2, %s198_s8  ;;  %p202_p8 = scmp.lt.u32.totalorder %s198_s8, %s270_s2 }
  0x64   :  { %p204_p9 = pnand %p202_p8, %p199_p7 }
  0x66   :  { %207 = shalt.err (!%p204_p9)
}
  0x67   :  { %119 = dma.vmem_to_hbm [thread:$0]  %s117_s4, 256, %s270_s2, [#allocation4]  }
  0x68   :  { %212 = dma.done.wait [#allocation4], 256  }
  0x69   :  { %213 = vsyncadd [#allocation4], 4294967040 }
  0x6a   :  { %123 = vsyncpa [#allocation3], 1 }
  0x6b   :  { %124 = vsyncpa [#allocation6], 1 }
  0x6c   :  { %125 = vsyncpa [#allocation4], 1 }

</bundles_post_ra>
